<compile_context>
chip_gen: v6e
topology: v6e:2x2x1
jax: 0.10.0
libtpu: 0.0.40
codegen_flags: <defaults>
</compile_context>

<pallas_src>
import functools

import jax
import jax.numpy as jnp
from jax import lax
from jax.experimental import pallas as pl
from jax.experimental.pallas import tpu as pltpu


def _round_up(x: int, m: int) -> int:
    return (x + m - 1) // m * m


def _default_num_splits() -> int:
    """2 grid splits only on megacore chips (2 TensorCores per device)."""
    try:
        kind = jax.devices()[0].device_kind.lower()
    except Exception:
        return 1
    if ("v4" in kind) or ("v5p" in kind) or ("7" in kind):
        return 2
    return 1


def _pick_vmem_limit() -> int:
    """Scoped-VMEM request: 3/4 of physical, capped (v5e/v6e -> 96 MiB, v7x -> 48 MiB)."""
    try:
        cap = int(pltpu.get_tpu_info().vmem_capacity_bytes)
    except Exception:
        cap = 64 * 1024 * 1024  # conservative: v7x per-TensorCore VMEM
    return max(32 * 1024 * 1024, min((cap * 3) // 4, 100 * 1024 * 1024))


def _pick_tile_n(n: int, c: int, num_splits: int, vmem_limit: int, align: int) -> int:
    """Largest row tile whose f32 working set stays comfortably inside VMEM.

    The double-buffered logits block plus a handful of same-sized f32
    temporaries (shifted / exp / one-hot select) dominate VMEM, so the budget
    is expressed in f32 bytes regardless of the input dtype.
    """
    per_row_f32 = c * 4
    block_budget = max(per_row_f32 * align, min(4 * 1024 * 1024, vmem_limit // 8))
    tile = max(align, (block_budget // per_row_f32) // align * align)
    rows_per_split = _round_up(max(1, pl.cdiv(n, num_splits)), align)
    return max(align, min(tile, rows_per_split))


def _apply_focal_modulation(picked_log_p, gamma: float):
    """(1 - p)**gamma * log(p) applied to the already-gathered (rows, 1) column."""
    if gamma == 0.0:
        # (1 - p)**0 == 1 (PyTorch pow(0, 0) == 1): skip entirely, avoids NaN.
        return picked_log_p
    one_minus_p = 1.0 - jnp.exp(picked_log_p)          # (rows, 1), single EUP exp
    if float(gamma).is_integer() and gamma <= 16:
        mod = one_minus_p
        for _ in range(int(gamma) - 1):                 # VPU multiplies, no pow
            mod = mod * one_minus_p
    else:
        mod = jnp.power(one_minus_p, jnp.float32(gamma))
    return mod * picked_log_p


def _focal_loss_kernel(x_ref, tgt_ref, wrow_ref, numer_ref, denom_ref, *,
                       gamma: float, tile_n: int, tiles_per_split: int,
                       true_n: int, has_tail: bool, use_mxu_rowsum: bool):
    """Per-tile body.

    x_ref     : (tile_n, C) logits tile in its native dtype (f32/bf16)
    tgt_ref   : (tile_n, 1) i32 class indices tile
    wrow_ref  : (tile_n, 1) f32 per-row class weight (gathered in the wrapper)
    numer_ref : (1, 8, 128) f32 per-split partial numerator (revisited accumulator)
    denom_ref : (1, 8, 128) f32 per-split partial denominator
    """
    s = pl.program_id(0)          # megacore split (parallel axis)
    i = pl.program_id(1)          # N-tile within the split (reduction axis)

    @pl.when(i == 0)
    def _init():
        numer_ref[...] = jnp.zeros_like(numer_ref)
        denom_ref[...] = jnp.zeros_like(denom_ref)

    # Upcast in-register: HBM traffic stays at the input's native width.
    logits = x_ref[...].astype(jnp.float32)                    # (tile_n, C)
    rows, c = logits.shape

    # Numerically stable log-softmax row statistics (all math in f32).
    row_max = jnp.max(logits, axis=-1, keepdims=True)           # (tile_n, 1)
    shifted = logits - row_max                                   # (tile_n, C)
    e = jnp.exp(shifted)
    if use_mxu_rowsum:
        # Row-sum on the otherwise idle MXU (relieves the XLU lane-reduce slot).
        ones = jnp.ones((c, 128), jnp.float32)
        sum_exp = jnp.dot(e, ones, preferred_element_type=jnp.float32,
                          precision=lax.Precision.HIGHEST)[:, :1]
    else:
        sum_exp = jnp.sum(e, axis=-1, keepdims=True)
    log_z = jnp.log(sum_exp)                                     # (tile_n, 1)

    # One-hot gather of the target column (no scatter/gather on TPU vregs).
    cls_ids = lax.broadcasted_iota(jnp.int32, (rows, c), 1)
    onehot = cls_ids == tgt_ref[...]
    picked_shifted = jnp.sum(jnp.where(onehot, shifted, 0.0), axis=-1, keepdims=True)
    picked_log_p = picked_shifted - log_z                        # log_softmax[r, t_r]

    # Focal modulation on the gathered (tile_n, 1) column only.
    p_term = _apply_focal_modulation(picked_log_p, gamma)
    w_row = wrow_ref[...]                                        # (tile_n, 1)
    neg_wp = -(w_row * p_term)

    def _accumulate(num_contrib, den_contrib):
        # (1, 1) partial sums broadcast-accumulate into the (1, 8, 128) slab.
        numer_ref[...] += jnp.sum(num_contrib, axis=0, keepdims=True)
        denom_ref[...] += jnp.sum(den_contrib, axis=0, keepdims=True)

    if not has_tail:
        _accumulate(neg_wp, w_row)
    else:
        row0 = (s * tiles_per_split + i) * tile_n
        is_full = row0 + tile_n <= true_n

        @pl.when(is_full)
        def _fast():
            _accumulate(neg_wp, w_row)

        @pl.when(jnp.logical_not(is_full))
        def _masked():
            row_ids = row0 + lax.broadcasted_iota(jnp.int32, (rows, 1), 0)
            valid = row_ids < true_n
            _accumulate(jnp.where(valid, neg_wp, 0.0),
                        jnp.where(valid, w_row, 0.0))


def _focal_loss_xla(logits, target2d, w_row, gamma: float):
    """Plain-XLA path used only when the class count cannot fit a VMEM tile."""
    log_p = jax.nn.log_softmax(logits.astype(jnp.float32), axis=-1)
    picked = jnp.take_along_axis(log_p, target2d, axis=-1)
    p_term = _apply_focal_modulation(picked, float(gamma))
    return jnp.sum(-w_row * p_term) / jnp.sum(w_row)


def focal_loss(logits, target, weight=None, gamma: float = 0.0, *,
               tile_n: int | None = None, num_splits: int | None = None):
    """Pallas-backed focal loss. logits: (N, C) f32/bf16, target: (N,) int."""
    n, c = logits.shape
    itemsize = jnp.dtype(logits.dtype).itemsize
    target2d = target.astype(jnp.int32).reshape(n, 1)

    # Per-row class weight gathered in the wrapper: an O(N) gather that removes
    # a (tile_n, C) select + one XLU lane reduction per tile from the kernel.
    if weight is None:
        w_row = jnp.ones((n, 1), dtype=jnp.float32)
    else:
        w_row = weight.astype(jnp.float32)[target].reshape(n, 1)

    if num_splits is None:
        num_splits = _default_num_splits()
    num_splits = max(1, int(num_splits))

    vmem_limit = _pick_vmem_limit()
    # Sublane packing: 8 rows for 32-bit, 16 for bf16, 32 for 8-bit inputs.
    align = 8 if itemsize >= 4 else max(8, 32 // itemsize)

    # Huge-C guard: even a minimum tile's working set would blow past VMEM.
    if 8 * align * c * 4 > vmem_limit:
        # TODO(synk): streaming-C (chunked online logsumexp) Pallas kernel for
        # vocab-sized class counts; fall back to XLA until then.
        return _focal_loss_xla(logits, target2d, w_row, gamma)

    if tile_n is None:
        tile_n = _pick_tile_n(n, c, num_splits, vmem_limit, align)
    tile_n = max(align, (int(tile_n) // align) * align)

    tiles_total = pl.cdiv(n, tile_n)
    num_splits = max(1, min(num_splits, tiles_total))
    tiles_per_split = pl.cdiv(tiles_total, num_splits)
    has_tail = (num_splits * tiles_per_split * tile_n) != n
    last_blk = tiles_total - 1

    # Offload the widest lane reduction to the idle MXU when C is large enough
    # for the mat-vec to be worthwhile (and its ones operand stays small).
    use_mxu_rowsum = (c >= 256) and (c <= 8192)

    kernel = functools.partial(
        _focal_loss_kernel, gamma=float(gamma), tile_n=tile_n,
        tiles_per_split=tiles_per_split, true_n=n, has_tail=has_tail,
        use_mxu_rowsum=use_mxu_rowsum)

    # No wrapper-side padding: the cdiv grid may overrun N. Block indices are
    # clamped to the last real block (so no fully-out-of-bounds DMA is issued)
    # and overrun rows are masked in-kernel before the axis-0 sums.
    def row_block_map(s, i):
        return (jnp.minimum(s * tiles_per_split + i, last_blk), 0)

    partial_shape = jax.ShapeDtypeStruct((num_splits, 8, 128), jnp.float32)

    numer, denom = pl.pallas_call(
        kernel,
        out_shape=(partial_shape, partial_shape),
        grid_spec=pltpu.PrefetchScalarGridSpec(
            num_scalar_prefetch=0,
            grid=(num_splits, tiles_per_split),
            in_specs=[
                pl.BlockSpec((tile_n, c), row_block_map),   # logits (native dtype)
                pl.BlockSpec((tile_n, 1), row_block_map),   # target ids
                pl.BlockSpec((tile_n, 1), row_block_map),   # per-row weight
            ],
            out_specs=[
                pl.BlockSpec((1, 8, 128), lambda s, i: (s, 0, 0)),
                pl.BlockSpec((1, 8, 128), lambda s, i: (s, 0, 0)),
            ],
        ),
        compiler_params=pltpu.CompilerParams(
            dimension_semantics=("parallel", "arbitrary"),
            vmem_limit_bytes=vmem_limit,
        ),
    )(logits, target2d, w_row)

    # Finish the weighted-mean reduction across splits in the wrapper.
    return jnp.sum(numer[:, 0, 0]) / jnp.sum(denom[:, 0, 0])


def focal_loss_ref(logits, target, weight, gamma):
    """Pure-JAX reference mirroring the PyTorch module."""
    log_p = jax.nn.log_softmax(logits.astype(jnp.float32), axis=-1)
    prob = jnp.exp(log_p)
    p = (1.0 - prob) ** gamma * log_p
    w = weight[target]
    picked = jnp.take_along_axis(p, target[:, None], axis=-1)[:, 0]
    return jnp.sum(-w * picked) / jnp.sum(w)


if __name__ == "__main__":
    key = jax.random.PRNGKey(0)

    def check(n, c, gamma, use_weight, tile_n=None, num_splits=None,
              dtype=jnp.float32, rtol=1e-4, atol=1e-5):
        k1, k2 = jax.random.split(jax.random.fold_in(key, n * 131 + c), 2)
        logits = jax.random.normal(k1, (n, c), dtype=jnp.float32).astype(dtype)
        target = jax.random.randint(k2, (n,), 0, c, dtype=jnp.int32)
        weight = (0.5 + 0.05 * jnp.arange(c, dtype=jnp.float32)) if use_weight else None
        loss = focal_loss(logits, target, weight=weight, gamma=gamma,
                          tile_n=tile_n, num_splits=num_splits)
        jax.block_until_ready(loss)
        w_ref = weight if weight is not None else jnp.ones((c,), jnp.float32)
        ref = focal_loss_ref(logits, target, w_ref, gamma)
        assert jnp.allclose(loss, ref, rtol=rtol, atol=atol), (n, c, gamma, dtype, loss, ref)

    # Module defaults (gamma=0, no weight), small shape, auto tiling/splits.
    check(8, 16, 0.0, use_weight=False)
    # Typical focal setting, integer gamma (repeated-multiply path), with weights.
    check(8, 16, 2.0, use_weight=True)
    # Multi-tile + forced megacore split + unpadded/masked tail: N not a tile
    # multiple and one tile slot is fully out of range (clamped block index).
    check(300, 16, 2.0, use_weight=True, tile_n=64, num_splits=2)
    # Non-integer gamma exercises the jnp.power fallback.
    check(64, 16, 1.5, use_weight=True, tile_n=16)
    # C >= 256 exercises the MXU row-sum offload path.
    check(64, 256, 2.0, use_weight=True)
    # bf16 logits: streamed at native width, upcast to f32 in-register.
    check(128, 16, 2.0, use_weight=True, tile_n=32, dtype=jnp.bfloat16)

    print("KERNEL_OK")
</pallas_src>

<mosaic_0001>
module attributes {stable_mosaic.version = 11 : i64} {
  func.func @_focal_loss_kernel(%arg0: i32, %arg1: i32, %arg2: memref<8x16xf32, #tpu.memory_space<vmem>>, %arg3: memref<8x1xi32, #tpu.memory_space<vmem>>, %arg4: memref<8x1xf32, #tpu.memory_space<vmem>>, %arg5: memref<1x8x128xf32, #tpu.memory_space<vmem>>, %arg6: memref<1x8x128xf32, #tpu.memory_space<vmem>>) attributes {dimension_semantics = [#tpu.dimension_semantics<parallel>, #tpu.dimension_semantics<arbitrary>], iteration_bounds = array<i64: 1, 1>, scalar_prefetch = 0 : i64, scratch_operands = 0 : i64, tpu.core_type = #tpu.core_type<tc>, window_params = [{transform_indices = @transform_0, window_bounds = array<i64: 8, 16>}, {transform_indices = @transform_1, window_bounds = array<i64: 8, 1>}, {transform_indices = @transform_2, window_bounds = array<i64: 8, 1>}, {transform_indices = @transform_3, window_bounds = array<i64: 1, 8, 128>}, {transform_indices = @transform_4, window_bounds = array<i64: 1, 8, 128>}]} {
    %c0_i32 = arith.constant 0 : i32
    %0 = arith.cmpi eq, %arg1, %c0_i32 : i32
    %1 = arith.extui %0 : i1 to i32
    %c0_i32_0 = arith.constant 0 : i32
    %2 = arith.cmpi ne, %1, %c0_i32_0 : i32
    scf.if %2 {
      %cst_24 = arith.constant 0.000000e+00 : f32
      %39 = vector.broadcast %cst_24 : f32 to vector<1x8x128xf32>
      %c0_25 = arith.constant 0 : index
      %c0_26 = arith.constant 0 : index
      %c0_27 = arith.constant 0 : index
      %40 = vector.load %arg5[%c0_25, %c0_26, %c0_27] : memref<1x8x128xf32, #tpu.memory_space<vmem>>, vector<1x8x128xf32>
      tpu.vector_store %arg5[%c0_25, %c0_26, %c0_27], %39 {strides = array<i32>} : memref<1x8x128xf32, #tpu.memory_space<vmem>>, vector<1x8x128xf32>,
      %cst_28 = arith.constant 0.000000e+00 : f32
      %41 = vector.broadcast %cst_28 : f32 to vector<1x8x128xf32>
      %c0_29 = arith.constant 0 : index
      %c0_30 = arith.constant 0 : index
      %c0_31 = arith.constant 0 : index
      %42 = vector.load %arg6[%c0_29, %c0_30, %c0_31] : memref<1x8x128xf32, #tpu.memory_space<vmem>>, vector<1x8x128xf32>
      tpu.vector_store %arg6[%c0_29, %c0_30, %c0_31], %41 {strides = array<i32>} : memref<1x8x128xf32, #tpu.memory_space<vmem>>, vector<1x8x128xf32>,
    } else {
    }
    %c0 = arith.constant 0 : index
    %c0_1 = arith.constant 0 : index
    %3 = vector.load %arg2[%c0, %c0_1] : memref<8x16xf32, #tpu.memory_space<vmem>>, vector<8x16xf32>
    %cst = arith.constant dense<0xFF800000> : vector<8xf32>
    %4 = vector.multi_reduction <maximumf>, %3, %cst [1] : vector<8x16xf32> to vector<8xf32>
    %5 = vector.shape_cast %4 : vector<8xf32> to vector<8x1xf32>
    %6 = vector.broadcast %5 : vector<8x1xf32> to vector<8x16xf32>
    %7 = arith.subf %3, %6 : vector<8x16xf32>
    %8 = math.exp %7 : vector<8x16xf32>
    %cst_2 = arith.constant dense<0.000000e+00> : vector<8xf32>
    %9 = vector.multi_reduction <add>, %8, %cst_2 [1] : vector<8x16xf32> to vector<8xf32>
    %10 = vector.shape_cast %9 : vector<8xf32> to vector<8x1xf32>
    %11 = math.log %10 : vector<8x1xf32>
    %12 = tpu.iota {dimensions = array<i32: 1>} : vector<8x16xi32>
    %c0_3 = arith.constant 0 : index
    %c0_4 = arith.constant 0 : index
    %13 = vector.load %arg3[%c0_3, %c0_4] : memref<8x1xi32, #tpu.memory_space<vmem>>, vector<8x1xi32>
    %14 = vector.broadcast %13 : vector<8x1xi32> to vector<8x16xi32>
    %15 = arith.cmpi eq, %12, %14 : vector<8x16xi32>
    %cst_5 = arith.constant 0.000000e+00 : f32
    %16 = vector.broadcast %cst_5 : f32 to vector<8x16xf32>
    %17 = arith.select %15, %7, %16 : vector<8x16xi1>, vector<8x16xf32>
    %cst_6 = arith.constant dense<0.000000e+00> : vector<8xf32>
    %18 = vector.multi_reduction <add>, %17, %cst_6 [1] : vector<8x16xf32> to vector<8xf32>
    %19 = vector.shape_cast %18 : vector<8xf32> to vector<8x1xf32>
    %20 = arith.subf %19, %11 : vector<8x1xf32>
    %c0_7 = arith.constant 0 : index
    %c0_8 = arith.constant 0 : index
    %21 = vector.load %arg4[%c0_7, %c0_8] : memref<8x1xf32, #tpu.memory_space<vmem>>, vector<8x1xf32>
    %22 = arith.mulf %21, %20 : vector<8x1xf32>
    %cst_9 = arith.constant 0.000000e+00 : f32
    %23 = vector.broadcast %cst_9 : f32 to vector<8x1xf32>
    %24 = arith.subf %23, %22 : vector<8x1xf32>
    %c0_10 = arith.constant 0 : index
    %c0_11 = arith.constant 0 : index
    %c0_12 = arith.constant 0 : index
    %25 = vector.load %arg5[%c0_10, %c0_11, %c0_12] : memref<1x8x128xf32, #tpu.memory_space<vmem>>, vector<1x8x128xf32>
    %cst_13 = arith.constant dense<0.000000e+00> : vector<1xf32>
    %26 = vector.multi_reduction <add>, %24, %cst_13 [0] : vector<8x1xf32> to vector<1xf32>
    %27 = vector.shape_cast %26 : vector<1xf32> to vector<1x1xf32>
    %28 = vector.shape_cast %27 : vector<1x1xf32> to vector<1x1x1xf32>
    %29 = vector.broadcast %28 : vector<1x1x1xf32> to vector<1x8x128xf32>
    %30 = arith.addf %25, %29 : vector<1x8x128xf32>
    %c0_14 = arith.constant 0 : index
    %c0_15 = arith.constant 0 : index
    %c0_16 = arith.constant 0 : index
    %31 = vector.load %arg5[%c0_14, %c0_15, %c0_16] : memref<1x8x128xf32, #tpu.memory_space<vmem>>, vector<1x8x128xf32>
    tpu.vector_store %arg5[%c0_14, %c0_15, %c0_16], %30 {strides = array<i32>} : memref<1x8x128xf32, #tpu.memory_space<vmem>>, vector<1x8x128xf32>,
    %c0_17 = arith.constant 0 : index
    %c0_18 = arith.constant 0 : index
    %c0_19 = arith.constant 0 : index
    %32 = vector.load %arg6[%c0_17, %c0_18, %c0_19] : memref<1x8x128xf32, #tpu.memory_space<vmem>>, vector<1x8x128xf32>
    %cst_20 = arith.constant dense<0.000000e+00> : vector<1xf32>
    %33 = vector.multi_reduction <add>, %21, %cst_20 [0] : vector<8x1xf32> to vector<1xf32>
    %34 = vector.shape_cast %33 : vector<1xf32> to vector<1x1xf32>
    %35 = vector.shape_cast %34 : vector<1x1xf32> to vector<1x1x1xf32>
    %36 = vector.broadcast %35 : vector<1x1x1xf32> to vector<1x8x128xf32>
    %37 = arith.addf %32, %36 : vector<1x8x128xf32>
    %c0_21 = arith.constant 0 : index
    %c0_22 = arith.constant 0 : index
    %c0_23 = arith.constant 0 : index
    %38 = vector.load %arg6[%c0_21, %c0_22, %c0_23] : memref<1x8x128xf32, #tpu.memory_space<vmem>>, vector<1x8x128xf32>
    tpu.vector_store %arg6[%c0_21, %c0_22, %c0_23], %37 {strides = array<i32>} : memref<1x8x128xf32, #tpu.memory_space<vmem>>, vector<1x8x128xf32>,
    return
  }
  func.func @transform_0(%arg0: i32, %arg1: i32) -> (i32, i32) {
    %c1_i32 = arith.constant 1 : i32
    %0 = arith.muli %arg0, %c1_i32 : i32
    %1 = arith.addi %0, %arg1 : i32
    %c0_i32 = arith.constant 0 : i32
    %2 = arith.minsi %1, %c0_i32 : i32
    %c0_i32_0 = arith.constant 0 : i32
    %c0_i32_1 = arith.constant 0 : i32
    return %2, %c0_i32_0 : i32, i32
  }
  func.func @transform_1(%arg0: i32, %arg1: i32) -> (i32, i32) {
    %c1_i32 = arith.constant 1 : i32
    %0 = arith.muli %arg0, %c1_i32 : i32
    %1 = arith.addi %0, %arg1 : i32
    %c0_i32 = arith.constant 0 : i32
    %2 = arith.minsi %1, %c0_i32 : i32
    %c0_i32_0 = arith.constant 0 : i32
    %c0_i32_1 = arith.constant 0 : i32
    return %2, %c0_i32_0 : i32, i32
  }
  func.func @transform_2(%arg0: i32, %arg1: i32) -> (i32, i32) {
    %c1_i32 = arith.constant 1 : i32
    %0 = arith.muli %arg0, %c1_i32 : i32
    %1 = arith.addi %0, %arg1 : i32
    %c0_i32 = arith.constant 0 : i32
    %2 = arith.minsi %1, %c0_i32 : i32
    %c0_i32_0 = arith.constant 0 : i32
    %c0_i32_1 = arith.constant 0 : i32
    return %2, %c0_i32_0 : i32, i32
  }
  func.func @transform_3(%arg0: i32, %arg1: i32) -> (i32, i32, i32) {
    %c0_i32 = arith.constant 0 : i32
    %c0_i32_0 = arith.constant 0 : i32
    %c0_i32_1 = arith.constant 0 : i32
    return %arg0, %c0_i32, %c0_i32_0 : i32, i32, i32
  }
  func.func @transform_4(%arg0: i32, %arg1: i32) -> (i32, i32, i32) {
    %c0_i32 = arith.constant 0 : i32
    %c0_i32_0 = arith.constant 0 : i32
    %c0_i32_1 = arith.constant 0 : i32
    return %arg0, %c0_i32, %c0_i32_0 : i32, i32, i32
  }
}

</mosaic_0001>

<bundles_post_ra>
// kernel: tpu_custom_call.1
= control target key start
LH: loop header
LB: loop body
LE: loop exit
PB: predicated region body
PF: predicated region fallthrough
CT: control target
= control target key end

     0   :  { %10 = vsyncpa [#allocation3], 0  ;;  %vm106_vm0 = vcmask 130048   ;;  %s310_s0 = inlined_call_operand.vmem [shape: f32[8,16], index: 0, kind: input, shape index: {}]   ;;  %s311_s1 = inlined_call_operand.vmem [shape: s32[8,1], index: 1, kind: input, shape index: {}]   ;;  %s312_s2 = inlined_call_operand.vmem [shape: f32[8,1], index: 2, kind: input, shape index: {}]   ;;  %s313_s3 = inlined_call_operand.hbm [shape: f32[1,8,128], index: 3, kind: output, shape index: {0}]   ;;  %s314_s4 = inlined_call_operand.hbm [shape: f32[1,8,128], index: 4, kind: output, shape index: {1}]  }
   0x1   :  { %v105_v0 = vld [vmem:[%s310_s0] sm:$0xff] }
   0x2   :  { %11 = vsyncpa [#allocation5], 0  ;;  %v107_v1 = vsel %vm106_vm0, %v105_v0, -inf  ;;  %v264_v2 = vmov 0   ;;  %v120_v3 = vld [vmem:[%s311_s1] sm:$0xff]  ;;  %v118_v7 = vlaneseq  ;;  %vm134_vm2 = vcmask 7168  }
   0x3   :  { %214 = vset.pattern.permute.xlu0 %v264_v2  ;;  %215 = vset.pattern.permute.xlu1 %v264_v2  ;;  %v130_v15 = vld [vmem:[%s312_s2] sm:$0xff]  ;;  %s265_s2 = smov [#allocation2]   ;;  %s266_s20 = smov [#allocation4]  }
   0x4   :  { %108 = vmax.xlane.f32.xlu0 %v107_v1  ;;  %v119_v8 = vand.u32 127, %v118_v7  ;;  %v150_v16 = vsel %vm134_vm2, %v130_v15, 0.0  ;;  %s170_s19 = sshll.u32 %s265_s2, 4  ;;  %s180_s21 = sshll.u32 %s266_s20, 4  ;;  %s171_s19 = int_to_ptr.vmem [resolvable:$true] %s170_s19  ;;  %s181_s21 = int_to_ptr.vmem [resolvable:$true] %s180_s21 }
   0x5   :  { %v151_v19 = vrot.slane %v150_v16, 4  ;;  %s220_s22 = scalar_lea.vmem %s171_s19, 128  ;;  %p225_p1 = scmp.lt.s32.totalorder %s171_s19, %s171_s19 }
   0x6   :  { %p221_p0 = scmp.ne.s32.totalorder %s171_s19, %s220_s22  ;;  %p226_p2 = scmp.lt.s32.totalorder %s220_s22, %s220_s22 }
   0x7   :  { %v152_v23 = vadd.f32 %v151_v19, %v150_v16 }
   0x8   :  { %p227_p3 = por %p226_p2, %p225_p1 }
   0x9   :  { %v153_v26 = vrot.slane %v152_v23, 2 }
   0xa   :  { %p228_p4 = pnand %p227_p3, %p221_p0 }
   0xb   :  { %v154_v30 = vadd.f32 %v153_v26, %v152_v23 }
   0xd   :  { %v155_v33 = vrot.slane %v154_v30, 1 }
   0xf   :  { %v156_v35 = vadd.f32 %v155_v33, %v154_v30 }
  0x1a   :  { %122 = vperm.xlu0 %214, %v120_v3  }
  0x8d   :  { %v109_v4 = vpop.xlane.xlu0 %108 }
  0x8e   :  { %v110_v5 = vsub.f32 %v105_v0, %v109_v4 }
  0x90   :  { %v111_v6 = vmul.f32 1.442695, %v110_v5 }
  0x92   :  { %216 = vpow2.f32 %v111_v6 }
  0x95   :  { %v123_v9 = vpop.permute.xlu0 %122 }
  0x96   :  { %vm124_vm1 = vcmp.eq.s32.totalorder %v119_v8, %v123_v9 }
  0x97   :  { %v125_v12 = vsel %vm124_vm1, %v110_v5, 0.0 }
  0x98   :  { %v126_v13 = vsel %vm106_vm0, %v125_v12, 0.0 }
  0x9f   :  { %v217_v10 = vpop.eup %216 }
  0xa0   :  { %v113_v11 = vsel %vm106_vm0, %v217_v10, 0.0 }
  0xa1   :  { %114 = vadd.xlane.f32.xlu1 %v113_v11 }
  0xa5   :  { %127 = vadd.xlane.f32.xlu1 %v126_v13 }
 0x12a   :  { %v115_v14 = vpop.xlane.xlu1 %114 }
 0x12b   :  { %218 = vlog2.f32 %v115_v14 }
 0x12e   :  { %v128_v20 = vpop.xlane.xlu1 %127 }
 0x138   :  { %v219_v17 = vpop.eup %218 }
 0x139   :  { %v117_v18 = vmul.f32 0.6931472, %v219_v17 }
 0x13b   :  { %v129_v21 = vsub.f32 %v128_v20, %v117_v18 }
 0x13d   :  { %v131_v22 = vmul.f32 %v130_v15, %v129_v21 }
 0x13f   :  { %v132_v24 = vsub.f32 0.0, %v131_v22 }
 0x141   :  { %v135_v25 = vsel %vm134_vm2, %v132_v24, 0.0 }
 0x142   :  { %v136_v27 = vrot.slane %v135_v25, 4 }
 0x144   :  { %v137_v28 = vadd.f32 %v136_v27, %v135_v25 }
 0x146   :  { %v138_v29 = vrot.slane %v137_v28, 2 }
 0x148   :  { %v139_v31 = vadd.f32 %v138_v29, %v137_v28 }
 0x14a   :  { %v140_v32 = vrot.slane %v139_v31, 1 }
 0x14c   :  { %v141_v34 = vadd.f32 %v140_v32, %v139_v31 }
 0x14e   :  { %144 = vperm.xlu1 %215, %v141_v34  }
 0x152   :  { %159 = vperm.xlu1 %215, %v156_v35  }
 0x1c9   :  { %v145_v36 = vpop.permute.xlu1 %144 }
 0x1ca   :  { %148 = vst [vmem:[#allocation2] sm:$0xff] %v145_v36 }
 0x1cd   :  { %v160_v37 = vpop.permute.xlu1 %159 }
 0x1ce   :  { %231 = shalt.err (!%p228_p4)
}
 0x1cf   :  { %173 = dma.vmem_to_hbm [thread:$0]  %s171_s19, 128, %s313_s3, [#allocation3]   ;;  %163 = vst [vmem:[#allocation4] sm:$0xff] %v160_v37 }
 0x1d0   :  { %s240_s25 = scalar_lea.vmem %s181_s21, 128  ;;  %p245_p6 = scmp.lt.s32.totalorder %s181_s21, %s181_s21 }
 0x1d1   :  { %p241_p5 = scmp.ne.s32.totalorder %s181_s21, %s240_s25  ;;  %p246_p7 = scmp.lt.s32.totalorder %s240_s25, %s240_s25 }
 0x1d3   :  { %p247_p8 = por %p246_p7, %p245_p6 }
 0x1d5   :  { %p248_p9 = pnand %p247_p8, %p241_p5 }
 0x1d7   :  { %251 = shalt.err (!%p248_p9)
}
 0x1d8   :  { %183 = dma.vmem_to_hbm [thread:$0]  %s181_s21, 128, %s314_s4, [#allocation5]  }
 0x1d9   :  { %260 = dma.done.wait [#allocation3], 128  }
 0x1da   :  { %261 = vsyncadd [#allocation3], 4294967168 }
 0x1db   :  { %262 = dma.done.wait [#allocation5], 128  }
 0x1dc   :  { %263 = vsyncadd [#allocation5], 4294967168 }
 0x1dd   :  { %190 = vsyncpa [#allocation3], 1 }
 0x1de   :  { %191 = vsyncpa [#allocation5], 1 }

</bundles_post_ra>
